<compile_context>
chip_gen: v5e
topology: v5e:2x2
jax: 0.10.0
libtpu: 0.0.40
codegen_flags: <defaults>
</compile_context>

<pallas_src>
import math

import jax
import jax.numpy as jnp
from jax.experimental import pallas as pl
from jax.experimental.pallas import tpu as pltpu


def _leaky_relu(x, slope=0.2):
    return jnp.where(x > 0, x, slope * x)


def _disc_kernel(x_ref, w1_ref, b1_ref, w2_ref, b2_ref, w3_ref, b3_ref,
                 w4_ref, out_ref):
    """One row tile of the stacked per-component MLP.

    x_ref  : (C, tb, n_classes) bf16  -- per-component feature slabs for this row tile
    w1_ref : (n_classes, 4F)    bf16  -- feature part of layer-1 weight
    b1_ref : (C, 4F)            f32   -- fused per-component layer-1 bias (w1[c,:] + b1)
    w2_ref : (4F, 2F) bf16 ; b2_ref : (1, 2F) f32
    w3_ref : (2F, F)  bf16 ; b3_ref : (1, F)  f32
    w4_ref : (1, F)   bf16
    out_ref: (1, tb)  f32  -- (1/C) * sum_c s_c   (b4 added in the wrapper)
    """
    C = x_ref.shape[0]
    tb = x_ref.shape[1]
    F = w4_ref.shape[1]

    q = jnp.zeros((tb, F), jnp.float32)
    for c in range(C):                       # C is a small compile-time constant
        xc = x_ref[c]                                        # (tb, n_classes) bf16
        h = jnp.dot(xc, w1_ref[...], preferred_element_type=jnp.float32)
        h = _leaky_relu(h + b1_ref[pl.ds(c, 1), :])          # + (1, 4F) fused bias
        h = jnp.dot(h.astype(jnp.bfloat16), w2_ref[...],
                    preferred_element_type=jnp.float32)
        h = _leaky_relu(h + b2_ref[...])
        h = jnp.dot(h.astype(jnp.bfloat16), w3_ref[...],
                    preferred_element_type=jnp.float32)
        h = _leaky_relu(h + b3_ref[...])                     # (tb, F) f32
        q = q + h                                            # last layer is linear

    # Fused last layer + component mean: (1, F) x (F, tb) -> lane-dense (1, tb).
    qt = q.T.astype(jnp.bfloat16)                            # (F, tb)
    out = jnp.dot(w4_ref[...], qt, preferred_element_type=jnp.float32)
    out_ref[...] = out * (1.0 / C)


def conditional_component_discriminator(components, params, *, n_components,
                                        n_classes, row_tile=512):
    """components: (B, n_components, n_classes) f32 -> (B, 1) f32."""
    B = components.shape[0]
    C = n_components
    w1, b1, w2, b2, w3, b3, w4, b4 = params

    # --- tiny wrapper-side prep (no per-row broadcast tables) ---
    # [onehot_c, feats] @ W1 + b1 == feats @ W1[C:, :] + (W1[c, :] + b1)
    b1_table = (w1[:C, :] + b1).astype(jnp.float32)          # (C, 4F)
    w1_feat = w1[C:, :].astype(jnp.bfloat16)                 # (n_classes, 4F)
    w2b = w2.astype(jnp.bfloat16)
    w3b = w3.astype(jnp.bfloat16)
    w4_row = w4.T.astype(jnp.bfloat16)                       # (1, F)

    # Row tiling: one lane-dense (1, tb) output block per grid step.
    if B <= row_tile:
        tb, b_pad = B, B
    else:
        tb = row_tile                                        # multiple of 128
        b_pad = ((B + tb - 1) // tb) * tb

    x = components.astype(jnp.float32)
    if b_pad != B:
        x = jnp.pad(x, ((0, b_pad - B), (0, 0), (0, 0)))
    # Single fused transpose + bf16 cast -> (C, B_pad, n_classes) layout so each
    # component is a leading-dim slab inside the kernel.
    x_t = jnp.transpose(x, (1, 0, 2)).astype(jnp.bfloat16)

    def _wspec(arr):                                         # resident weight/bias
        return pl.BlockSpec(arr.shape, lambda i, _n=arr.ndim: (0,) * _n)

    out = pl.pallas_call(
        _disc_kernel,
        out_shape=jax.ShapeDtypeStruct((1, b_pad), jnp.float32),
        grid=(b_pad // tb,),
        in_specs=[
            pl.BlockSpec((C, tb, n_classes), lambda i: (0, i, 0)),
            _wspec(w1_feat), _wspec(b1_table),
            _wspec(w2b), _wspec(b2),
            _wspec(w3b), _wspec(b3),
            _wspec(w4_row),
        ],
        out_specs=pl.BlockSpec((1, tb), lambda i: (0, i)),
        compiler_params=pltpu.CompilerParams(
            dimension_semantics=("parallel",),
            vmem_limit_bytes=32 * 1024 * 1024),
    )(x_t, w1_feat, b1_table, w2b, b2, w3b, b3, w4_row)

    # b4 is the same for every component: mean_c (s_c + b4) = mean_c s_c + b4.
    return out[0, :B].reshape(B, 1) + b4


def init_params(key, n_components, n_classes, n_features):
    """Deterministic kaiming-normal weights (stored (in, out)) + uniform biases."""
    dims = [
        (n_components + n_classes, n_features * 4),
        (n_features * 4, n_features * 2),
        (n_features * 2, n_features),
        (n_features, 1),
    ]
    params = []
    for fan_in, fan_out in dims:
        key, kw, kb = jax.random.split(key, 3)
        w = jax.random.normal(kw, (fan_in, fan_out), jnp.float32) * math.sqrt(2.0 / fan_in)
        bound = 1.0 / math.sqrt(fan_in)
        b = jax.random.uniform(kb, (1, fan_out), jnp.float32, -bound, bound)
        params += [w, b]
    return tuple(params)


def reference(components, params, n_components):
    """Pure-JAX f32 reference mirroring the PyTorch forward loop."""
    w1, b1, w2, b2, w3, b3, w4, b4 = params
    B = components.shape[0]
    score = jnp.zeros((B, 1), jnp.float32)
    for i in range(n_components):
        labels = jnp.zeros((B, n_components), jnp.float32).at[:, i].set(1.0)
        x = jnp.concatenate([labels, components[:, i, :]], axis=1)
        h = jax.nn.leaky_relu(x @ w1 + b1, 0.2)
        h = jax.nn.leaky_relu(h @ w2 + b2, 0.2)
        h = jax.nn.leaky_relu(h @ w3 + b3, 0.2)
        score = score + (h @ w4 + b4)
    return score / n_components


if __name__ == "__main__":
    n_components, n_classes, n_features, batch = 4, 8, 32, 8

    key = jax.random.PRNGKey(0)
    kp, kx = jax.random.split(key)
    params = init_params(kp, n_components, n_classes, n_features)
    components = jax.random.normal(kx, (batch, n_components, n_classes), jnp.float32)

    out = conditional_component_discriminator(
        components, params, n_components=n_components, n_classes=n_classes)
    out = jax.block_until_ready(out)

    ref = reference(components, params, n_components)
    assert out.shape == (batch, 1), out.shape
    # bf16 matmuls with f32 accumulation -> loosened tolerance vs the f32 reference.
    assert jnp.allclose(out, ref, atol=5e-2, rtol=5e-2), (out, ref)
    print("KERNEL_OK")
</pallas_src>

<mosaic_0001>
module attributes {stable_mosaic.version = 11 : i64} {
  func.func @_disc_kernel(%arg0: i32, %arg1: memref<4x8x8xbf16, #tpu.memory_space<vmem>>, %arg2: memref<8x128xbf16, #tpu.memory_space<vmem>>, %arg3: memref<4x128xf32, #tpu.memory_space<vmem>>, %arg4: memref<128x64xbf16, #tpu.memory_space<vmem>>, %arg5: memref<1x64xf32, #tpu.memory_space<vmem>>, %arg6: memref<64x32xbf16, #tpu.memory_space<vmem>>, %arg7: memref<1x32xf32, #tpu.memory_space<vmem>>, %arg8: memref<1x32xbf16, #tpu.memory_space<vmem>>, %arg9: memref<1x8xf32, #tpu.memory_space<vmem>>) attributes {dimension_semantics = [#tpu.dimension_semantics<parallel>], iteration_bounds = array<i64: 1>, scalar_prefetch = 0 : i64, scratch_operands = 0 : i64, tpu.core_type = #tpu.core_type<tc>, window_params = [{transform_indices = @transform_0, window_bounds = array<i64: 4, 8, 8>}, {pipeline_mode = #tpu.pipeline_mode<synchronous>, transform_indices = @transform_1, window_bounds = array<i64: 8, 128>}, {pipeline_mode = #tpu.pipeline_mode<synchronous>, transform_indices = @transform_2, window_bounds = array<i64: 4, 128>}, {pipeline_mode = #tpu.pipeline_mode<synchronous>, transform_indices = @transform_3, window_bounds = array<i64: 128, 64>}, {pipeline_mode = #tpu.pipeline_mode<synchronous>, transform_indices = @transform_4, window_bounds = array<i64: 1, 64>}, {pipeline_mode = #tpu.pipeline_mode<synchronous>, transform_indices = @transform_5, window_bounds = array<i64: 64, 32>}, {pipeline_mode = #tpu.pipeline_mode<synchronous>, transform_indices = @transform_6, window_bounds = array<i64: 1, 32>}, {pipeline_mode = #tpu.pipeline_mode<synchronous>, transform_indices = @transform_7, window_bounds = array<i64: 1, 32>}, {transform_indices = @transform_8, window_bounds = array<i64: 1, 8>}]} {
    %cst = arith.constant 0.000000e+00 : f32
    %0 = vector.broadcast %cst : f32 to vector<8x32xf32>
    %c0 = arith.constant 0 : index
    %c0_0 = arith.constant 0 : index
    %c0_1 = arith.constant 0 : index
    %1 = vector.load %arg1[%c0, %c0_0, %c0_1] : memref<4x8x8xbf16, #tpu.memory_space<vmem>>, vector<1x8x8xbf16>
    %2 = vector.shape_cast %1 : vector<1x8x8xbf16> to vector<8x8xbf16>
    %c0_2 = arith.constant 0 : index
    %c0_3 = arith.constant 0 : index
    %3 = vector.load %arg2[%c0_2, %c0_3] : memref<8x128xbf16, #tpu.memory_space<vmem>>, vector<8x128xbf16>
    %cst_4 = arith.constant dense<0.000000e+00> : vector<8x128xf32>
    %4 = tpu.matmul %2, %3, %cst_4 {dimension_numbers = #tpu.dot_dimension_numbers<[1], [0], [0], [1], [0, 0, 1, 1], [], []>} : vector<8x8xbf16>, vector<8x128xbf16>, vector<8x128xf32> -> vector<8x128xf32>
    %c0_5 = arith.constant 0 : index
    %c0_6 = arith.constant 0 : index
    %5 = vector.load %arg3[%c0_5, %c0_6] : memref<4x128xf32, #tpu.memory_space<vmem>>, vector<1x128xf32>
    %6 = vector.broadcast %5 : vector<1x128xf32> to vector<8x128xf32>
    %7 = arith.addf %4, %6 : vector<8x128xf32>
    %cst_7 = arith.constant 0.000000e+00 : f32
    %8 = vector.broadcast %cst_7 : f32 to vector<8x128xf32>
    %9 = arith.cmpf ogt, %7, %8 : vector<8x128xf32>
    %cst_8 = arith.constant 2.000000e-01 : f32
    %10 = vector.broadcast %cst_8 : f32 to vector<8x128xf32>
    %11 = arith.mulf %10, %7 : vector<8x128xf32>
    %12 = arith.select %9, %7, %11 : vector<8x128xi1>, vector<8x128xf32>
    %13 = arith.truncf %12 : vector<8x128xf32> to vector<8x128xbf16>
    %c0_9 = arith.constant 0 : index
    %c0_10 = arith.constant 0 : index
    %14 = vector.load %arg4[%c0_9, %c0_10] : memref<128x64xbf16, #tpu.memory_space<vmem>>, vector<128x64xbf16>
    %cst_11 = arith.constant dense<0.000000e+00> : vector<8x64xf32>
    %15 = tpu.matmul %13, %14, %cst_11 {dimension_numbers = #tpu.dot_dimension_numbers<[1], [0], [0], [1], [0, 0, 1, 1], [], []>} : vector<8x128xbf16>, vector<128x64xbf16>, vector<8x64xf32> -> vector<8x64xf32>
    %c0_12 = arith.constant 0 : index
    %c0_13 = arith.constant 0 : index
    %16 = vector.load %arg5[%c0_12, %c0_13] : memref<1x64xf32, #tpu.memory_space<vmem>>, vector<1x64xf32>
    %17 = vector.broadcast %16 : vector<1x64xf32> to vector<8x64xf32>
    %18 = arith.addf %15, %17 : vector<8x64xf32>
    %cst_14 = arith.constant 0.000000e+00 : f32
    %19 = vector.broadcast %cst_14 : f32 to vector<8x64xf32>
    %20 = arith.cmpf ogt, %18, %19 : vector<8x64xf32>
    %cst_15 = arith.constant 2.000000e-01 : f32
    %21 = vector.broadcast %cst_15 : f32 to vector<8x64xf32>
    %22 = arith.mulf %21, %18 : vector<8x64xf32>
    %23 = arith.select %20, %18, %22 : vector<8x64xi1>, vector<8x64xf32>
    %24 = arith.truncf %23 : vector<8x64xf32> to vector<8x64xbf16>
    %c0_16 = arith.constant 0 : index
    %c0_17 = arith.constant 0 : index
    %25 = vector.load %arg6[%c0_16, %c0_17] : memref<64x32xbf16, #tpu.memory_space<vmem>>, vector<64x32xbf16>
    %cst_18 = arith.constant dense<0.000000e+00> : vector<8x32xf32>
    %26 = tpu.matmul %24, %25, %cst_18 {dimension_numbers = #tpu.dot_dimension_numbers<[1], [0], [0], [1], [0, 0, 1, 1], [], []>} : vector<8x64xbf16>, vector<64x32xbf16>, vector<8x32xf32> -> vector<8x32xf32>
    %c0_19 = arith.constant 0 : index
    %c0_20 = arith.constant 0 : index
    %27 = vector.load %arg7[%c0_19, %c0_20] : memref<1x32xf32, #tpu.memory_space<vmem>>, vector<1x32xf32>
    %28 = vector.broadcast %27 : vector<1x32xf32> to vector<8x32xf32>
    %29 = arith.addf %26, %28 : vector<8x32xf32>
    %cst_21 = arith.constant 0.000000e+00 : f32
    %30 = vector.broadcast %cst_21 : f32 to vector<8x32xf32>
    %31 = arith.cmpf ogt, %29, %30 : vector<8x32xf32>
    %cst_22 = arith.constant 2.000000e-01 : f32
    %32 = vector.broadcast %cst_22 : f32 to vector<8x32xf32>
    %33 = arith.mulf %32, %29 : vector<8x32xf32>
    %34 = arith.select %31, %29, %33 : vector<8x32xi1>, vector<8x32xf32>
    %35 = arith.addf %0, %34 : vector<8x32xf32>
    %c1 = arith.constant 1 : index
    %c0_23 = arith.constant 0 : index
    %c0_24 = arith.constant 0 : index
    %36 = vector.load %arg1[%c1, %c0_23, %c0_24] : memref<4x8x8xbf16, #tpu.memory_space<vmem>>, vector<1x8x8xbf16>
    %37 = vector.shape_cast %36 : vector<1x8x8xbf16> to vector<8x8xbf16>
    %c0_25 = arith.constant 0 : index
    %c0_26 = arith.constant 0 : index
    %38 = vector.load %arg2[%c0_25, %c0_26] : memref<8x128xbf16, #tpu.memory_space<vmem>>, vector<8x128xbf16>
    %cst_27 = arith.constant dense<0.000000e+00> : vector<8x128xf32>
    %39 = tpu.matmul %37, %38, %cst_27 {dimension_numbers = #tpu.dot_dimension_numbers<[1], [0], [0], [1], [0, 0, 1, 1], [], []>} : vector<8x8xbf16>, vector<8x128xbf16>, vector<8x128xf32> -> vector<8x128xf32>
    %c1_28 = arith.constant 1 : index
    %c0_29 = arith.constant 0 : index
    %40 = vector.load %arg3[%c1_28, %c0_29] : memref<4x128xf32, #tpu.memory_space<vmem>>, vector<1x128xf32>
    %41 = vector.broadcast %40 : vector<1x128xf32> to vector<8x128xf32>
    %42 = arith.addf %39, %41 : vector<8x128xf32>
    %cst_30 = arith.constant 0.000000e+00 : f32
    %43 = vector.broadcast %cst_30 : f32 to vector<8x128xf32>
    %44 = arith.cmpf ogt, %42, %43 : vector<8x128xf32>
    %cst_31 = arith.constant 2.000000e-01 : f32
    %45 = vector.broadcast %cst_31 : f32 to vector<8x128xf32>
    %46 = arith.mulf %45, %42 : vector<8x128xf32>
    %47 = arith.select %44, %42, %46 : vector<8x128xi1>, vector<8x128xf32>
    %48 = arith.truncf %47 : vector<8x128xf32> to vector<8x128xbf16>
    %c0_32 = arith.constant 0 : index
    %c0_33 = arith.constant 0 : index
    %49 = vector.load %arg4[%c0_32, %c0_33] : memref<128x64xbf16, #tpu.memory_space<vmem>>, vector<128x64xbf16>
    %cst_34 = arith.constant dense<0.000000e+00> : vector<8x64xf32>
    %50 = tpu.matmul %48, %49, %cst_34 {dimension_numbers = #tpu.dot_dimension_numbers<[1], [0], [0], [1], [0, 0, 1, 1], [], []>} : vector<8x128xbf16>, vector<128x64xbf16>, vector<8x64xf32> -> vector<8x64xf32>
    %c0_35 = arith.constant 0 : index
    %c0_36 = arith.constant 0 : index
    %51 = vector.load %arg5[%c0_35, %c0_36] : memref<1x64xf32, #tpu.memory_space<vmem>>, vector<1x64xf32>
    %52 = vector.broadcast %51 : vector<1x64xf32> to vector<8x64xf32>
    %53 = arith.addf %50, %52 : vector<8x64xf32>
    %cst_37 = arith.constant 0.000000e+00 : f32
    %54 = vector.broadcast %cst_37 : f32 to vector<8x64xf32>
    %55 = arith.cmpf ogt, %53, %54 : vector<8x64xf32>
    %cst_38 = arith.constant 2.000000e-01 : f32
    %56 = vector.broadcast %cst_38 : f32 to vector<8x64xf32>
    %57 = arith.mulf %56, %53 : vector<8x64xf32>
    %58 = arith.select %55, %53, %57 : vector<8x64xi1>, vector<8x64xf32>
    %59 = arith.truncf %58 : vector<8x64xf32> to vector<8x64xbf16>
    %c0_39 = arith.constant 0 : index
    %c0_40 = arith.constant 0 : index
    %60 = vector.load %arg6[%c0_39, %c0_40] : memref<64x32xbf16, #tpu.memory_space<vmem>>, vector<64x32xbf16>
    %cst_41 = arith.constant dense<0.000000e+00> : vector<8x32xf32>
    %61 = tpu.matmul %59, %60, %cst_41 {dimension_numbers = #tpu.dot_dimension_numbers<[1], [0], [0], [1], [0, 0, 1, 1], [], []>} : vector<8x64xbf16>, vector<64x32xbf16>, vector<8x32xf32> -> vector<8x32xf32>
    %c0_42 = arith.constant 0 : index
    %c0_43 = arith.constant 0 : index
    %62 = vector.load %arg7[%c0_42, %c0_43] : memref<1x32xf32, #tpu.memory_space<vmem>>, vector<1x32xf32>
    %63 = vector.broadcast %62 : vector<1x32xf32> to vector<8x32xf32>
    %64 = arith.addf %61, %63 : vector<8x32xf32>
    %cst_44 = arith.constant 0.000000e+00 : f32
    %65 = vector.broadcast %cst_44 : f32 to vector<8x32xf32>
    %66 = arith.cmpf ogt, %64, %65 : vector<8x32xf32>
    %cst_45 = arith.constant 2.000000e-01 : f32
    %67 = vector.broadcast %cst_45 : f32 to vector<8x32xf32>
    %68 = arith.mulf %67, %64 : vector<8x32xf32>
    %69 = arith.select %66, %64, %68 : vector<8x32xi1>, vector<8x32xf32>
    %70 = arith.addf %35, %69 : vector<8x32xf32>
    %c2 = arith.constant 2 : index
    %c0_46 = arith.constant 0 : index
    %c0_47 = arith.constant 0 : index
    %71 = vector.load %arg1[%c2, %c0_46, %c0_47] : memref<4x8x8xbf16, #tpu.memory_space<vmem>>, vector<1x8x8xbf16>
    %72 = vector.shape_cast %71 : vector<1x8x8xbf16> to vector<8x8xbf16>
    %c0_48 = arith.constant 0 : index
    %c0_49 = arith.constant 0 : index
    %73 = vector.load %arg2[%c0_48, %c0_49] : memref<8x128xbf16, #tpu.memory_space<vmem>>, vector<8x128xbf16>
    %cst_50 = arith.constant dense<0.000000e+00> : vector<8x128xf32>
    %74 = tpu.matmul %72, %73, %cst_50 {dimension_numbers = #tpu.dot_dimension_numbers<[1], [0], [0], [1], [0, 0, 1, 1], [], []>} : vector<8x8xbf16>, vector<8x128xbf16>, vector<8x128xf32> -> vector<8x128xf32>
    %c2_51 = arith.constant 2 : index
    %c0_52 = arith.constant 0 : index
    %75 = vector.load %arg3[%c2_51, %c0_52] : memref<4x128xf32, #tpu.memory_space<vmem>>, vector<1x128xf32>
    %76 = vector.broadcast %75 : vector<1x128xf32> to vector<8x128xf32>
    %77 = arith.addf %74, %76 : vector<8x128xf32>
    %cst_53 = arith.constant 0.000000e+00 : f32
    %78 = vector.broadcast %cst_53 : f32 to vector<8x128xf32>
    %79 = arith.cmpf ogt, %77, %78 : vector<8x128xf32>
    %cst_54 = arith.constant 2.000000e-01 : f32
    %80 = vector.broadcast %cst_54 : f32 to vector<8x128xf32>
    %81 = arith.mulf %80, %77 : vector<8x128xf32>
    %82 = arith.select %79, %77, %81 : vector<8x128xi1>, vector<8x128xf32>
    %83 = arith.truncf %82 : vector<8x128xf32> to vector<8x128xbf16>
    %c0_55 = arith.constant 0 : index
    %c0_56 = arith.constant 0 : index
    %84 = vector.load %arg4[%c0_55, %c0_56] : memref<128x64xbf16, #tpu.memory_space<vmem>>, vector<128x64xbf16>
    %cst_57 = arith.constant dense<0.000000e+00> : vector<8x64xf32>
    %85 = tpu.matmul %83, %84, %cst_57 {dimension_numbers = #tpu.dot_dimension_numbers<[1], [0], [0], [1], [0, 0, 1, 1], [], []>} : vector<8x128xbf16>, vector<128x64xbf16>, vector<8x64xf32> -> vector<8x64xf32>
    %c0_58 = arith.constant 0 : index
    %c0_59 = arith.constant 0 : index
    %86 = vector.load %arg5[%c0_58, %c0_59] : memref<1x64xf32, #tpu.memory_space<vmem>>, vector<1x64xf32>
    %87 = vector.broadcast %86 : vector<1x64xf32> to vector<8x64xf32>
    %88 = arith.addf %85, %87 : vector<8x64xf32>
    %cst_60 = arith.constant 0.000000e+00 : f32
    %89 = vector.broadcast %cst_60 : f32 to vector<8x64xf32>
    %90 = arith.cmpf ogt, %88, %89 : vector<8x64xf32>
    %cst_61 = arith.constant 2.000000e-01 : f32
    %91 = vector.broadcast %cst_61 : f32 to vector<8x64xf32>
    %92 = arith.mulf %91, %88 : vector<8x64xf32>
    %93 = arith.select %90, %88, %92 : vector<8x64xi1>, vector<8x64xf32>
    %94 = arith.truncf %93 : vector<8x64xf32> to vector<8x64xbf16>
    %c0_62 = arith.constant 0 : index
    %c0_63 = arith.constant 0 : index
    %95 = vector.load %arg6[%c0_62, %c0_63] : memref<64x32xbf16, #tpu.memory_space<vmem>>, vector<64x32xbf16>
    %cst_64 = arith.constant dense<0.000000e+00> : vector<8x32xf32>
    %96 = tpu.matmul %94, %95, %cst_64 {dimension_numbers = #tpu.dot_dimension_numbers<[1], [0], [0], [1], [0, 0, 1, 1], [], []>} : vector<8x64xbf16>, vector<64x32xbf16>, vector<8x32xf32> -> vector<8x32xf32>
    %c0_65 = arith.constant 0 : index
    %c0_66 = arith.constant 0 : index
    %97 = vector.load %arg7[%c0_65, %c0_66] : memref<1x32xf32, #tpu.memory_space<vmem>>, vector<1x32xf32>
    %98 = vector.broadcast %97 : vector<1x32xf32> to vector<8x32xf32>
    %99 = arith.addf %96, %98 : vector<8x32xf32>
    %cst_67 = arith.constant 0.000000e+00 : f32
    %100 = vector.broadcast %cst_67 : f32 to vector<8x32xf32>
    %101 = arith.cmpf ogt, %99, %100 : vector<8x32xf32>
    %cst_68 = arith.constant 2.000000e-01 : f32
    %102 = vector.broadcast %cst_68 : f32 to vector<8x32xf32>
    %103 = arith.mulf %102, %99 : vector<8x32xf32>
    %104 = arith.select %101, %99, %103 : vector<8x32xi1>, vector<8x32xf32>
    %105 = arith.addf %70, %104 : vector<8x32xf32>
    %c3 = arith.constant 3 : index
    %c0_69 = arith.constant 0 : index
    %c0_70 = arith.constant 0 : index
    %106 = vector.load %arg1[%c3, %c0_69, %c0_70] : memref<4x8x8xbf16, #tpu.memory_space<vmem>>, vector<1x8x8xbf16>
    %107 = vector.shape_cast %106 : vector<1x8x8xbf16> to vector<8x8xbf16>
    %c0_71 = arith.constant 0 : index
    %c0_72 = arith.constant 0 : index
    %108 = vector.load %arg2[%c0_71, %c0_72] : memref<8x128xbf16, #tpu.memory_space<vmem>>, vector<8x128xbf16>
    %cst_73 = arith.constant dense<0.000000e+00> : vector<8x128xf32>
    %109 = tpu.matmul %107, %108, %cst_73 {dimension_numbers = #tpu.dot_dimension_numbers<[1], [0], [0], [1], [0, 0, 1, 1], [], []>} : vector<8x8xbf16>, vector<8x128xbf16>, vector<8x128xf32> -> vector<8x128xf32>
    %c3_74 = arith.constant 3 : index
    %c0_75 = arith.constant 0 : index
    %110 = vector.load %arg3[%c3_74, %c0_75] : memref<4x128xf32, #tpu.memory_space<vmem>>, vector<1x128xf32>
    %111 = vector.broadcast %110 : vector<1x128xf32> to vector<8x128xf32>
    %112 = arith.addf %109, %111 : vector<8x128xf32>
    %cst_76 = arith.constant 0.000000e+00 : f32
    %113 = vector.broadcast %cst_76 : f32 to vector<8x128xf32>
    %114 = arith.cmpf ogt, %112, %113 : vector<8x128xf32>
    %cst_77 = arith.constant 2.000000e-01 : f32
    %115 = vector.broadcast %cst_77 : f32 to vector<8x128xf32>
    %116 = arith.mulf %115, %112 : vector<8x128xf32>
    %117 = arith.select %114, %112, %116 : vector<8x128xi1>, vector<8x128xf32>
    %118 = arith.truncf %117 : vector<8x128xf32> to vector<8x128xbf16>
    %c0_78 = arith.constant 0 : index
    %c0_79 = arith.constant 0 : index
    %119 = vector.load %arg4[%c0_78, %c0_79] : memref<128x64xbf16, #tpu.memory_space<vmem>>, vector<128x64xbf16>
    %cst_80 = arith.constant dense<0.000000e+00> : vector<8x64xf32>
    %120 = tpu.matmul %118, %119, %cst_80 {dimension_numbers = #tpu.dot_dimension_numbers<[1], [0], [0], [1], [0, 0, 1, 1], [], []>} : vector<8x128xbf16>, vector<128x64xbf16>, vector<8x64xf32> -> vector<8x64xf32>
    %c0_81 = arith.constant 0 : index
    %c0_82 = arith.constant 0 : index
    %121 = vector.load %arg5[%c0_81, %c0_82] : memref<1x64xf32, #tpu.memory_space<vmem>>, vector<1x64xf32>
    %122 = vector.broadcast %121 : vector<1x64xf32> to vector<8x64xf32>
    %123 = arith.addf %120, %122 : vector<8x64xf32>
    %cst_83 = arith.constant 0.000000e+00 : f32
    %124 = vector.broadcast %cst_83 : f32 to vector<8x64xf32>
    %125 = arith.cmpf ogt, %123, %124 : vector<8x64xf32>
    %cst_84 = arith.constant 2.000000e-01 : f32
    %126 = vector.broadcast %cst_84 : f32 to vector<8x64xf32>
    %127 = arith.mulf %126, %123 : vector<8x64xf32>
    %128 = arith.select %125, %123, %127 : vector<8x64xi1>, vector<8x64xf32>
    %129 = arith.truncf %128 : vector<8x64xf32> to vector<8x64xbf16>
    %c0_85 = arith.constant 0 : index
    %c0_86 = arith.constant 0 : index
    %130 = vector.load %arg6[%c0_85, %c0_86] : memref<64x32xbf16, #tpu.memory_space<vmem>>, vector<64x32xbf16>
    %cst_87 = arith.constant dense<0.000000e+00> : vector<8x32xf32>
    %131 = tpu.matmul %129, %130, %cst_87 {dimension_numbers = #tpu.dot_dimension_numbers<[1], [0], [0], [1], [0, 0, 1, 1], [], []>} : vector<8x64xbf16>, vector<64x32xbf16>, vector<8x32xf32> -> vector<8x32xf32>
    %c0_88 = arith.constant 0 : index
    %c0_89 = arith.constant 0 : index
    %132 = vector.load %arg7[%c0_88, %c0_89] : memref<1x32xf32, #tpu.memory_space<vmem>>, vector<1x32xf32>
    %133 = vector.broadcast %132 : vector<1x32xf32> to vector<8x32xf32>
    %134 = arith.addf %131, %133 : vector<8x32xf32>
    %cst_90 = arith.constant 0.000000e+00 : f32
    %135 = vector.broadcast %cst_90 : f32 to vector<8x32xf32>
    %136 = arith.cmpf ogt, %134, %135 : vector<8x32xf32>
    %cst_91 = arith.constant 2.000000e-01 : f32
    %137 = vector.broadcast %cst_91 : f32 to vector<8x32xf32>
    %138 = arith.mulf %137, %134 : vector<8x32xf32>
    %139 = arith.select %136, %134, %138 : vector<8x32xi1>, vector<8x32xf32>
    %140 = arith.addf %105, %139 : vector<8x32xf32>
    %141 = tpu.transpose %140, [1, 0] : vector<8x32xf32> -> vector<32x8xf32>
    %142 = arith.truncf %141 : vector<32x8xf32> to vector<32x8xbf16>
    %c0_92 = arith.constant 0 : index
    %c0_93 = arith.constant 0 : index
    %143 = vector.load %arg8[%c0_92, %c0_93] : memref<1x32xbf16, #tpu.memory_space<vmem>>, vector<1x32xbf16>
    %cst_94 = arith.constant dense<0.000000e+00> : vector<1x8xf32>
    %144 = tpu.matmul %143, %142, %cst_94 {dimension_numbers = #tpu.dot_dimension_numbers<[1], [0], [0], [1], [0, 0, 1, 1], [], []>} : vector<1x32xbf16>, vector<32x8xbf16>, vector<1x8xf32> -> vector<1x8xf32>
    %cst_95 = arith.constant 2.500000e-01 : f32
    %145 = vector.broadcast %cst_95 : f32 to vector<1x8xf32>
    %146 = arith.mulf %144, %145 : vector<1x8xf32>
    %c0_96 = arith.constant 0 : index
    %c0_97 = arith.constant 0 : index
    %147 = vector.load %arg9[%c0_96, %c0_97] : memref<1x8xf32, #tpu.memory_space<vmem>>, vector<1x8xf32>
    tpu.vector_store %arg9[%c0_96, %c0_97], %146 {strides = array<i32>} : memref<1x8xf32, #tpu.memory_space<vmem>>, vector<1x8xf32>,
    return
  }
  func.func @transform_0(%arg0: i32) -> (i32, i32, i32) {
    %c0_i32 = arith.constant 0 : i32
    %c0_i32_0 = arith.constant 0 : i32
    %c0_i32_1 = arith.constant 0 : i32
    return %c0_i32, %arg0, %c0_i32_0 : i32, i32, i32
  }
  func.func @transform_1(%arg0: i32) -> (i32, i32) {
    %c0_i32 = arith.constant 0 : i32
    %c0_i32_0 = arith.constant 0 : i32
    %c0_i32_1 = arith.constant 0 : i32
    return %c0_i32, %c0_i32_0 : i32, i32
  }
  func.func @transform_2(%arg0: i32) -> (i32, i32) {
    %c0_i32 = arith.constant 0 : i32
    %c0_i32_0 = arith.constant 0 : i32
    %c0_i32_1 = arith.constant 0 : i32
    return %c0_i32, %c0_i32_0 : i32, i32
  }
  func.func @transform_3(%arg0: i32) -> (i32, i32) {
    %c0_i32 = arith.constant 0 : i32
    %c0_i32_0 = arith.constant 0 : i32
    %c0_i32_1 = arith.constant 0 : i32
    return %c0_i32, %c0_i32_0 : i32, i32
  }
  func.func @transform_4(%arg0: i32) -> (i32, i32) {
    %c0_i32 = arith.constant 0 : i32
    %c0_i32_0 = arith.constant 0 : i32
    %c0_i32_1 = arith.constant 0 : i32
    return %c0_i32, %c0_i32_0 : i32, i32
  }
  func.func @transform_5(%arg0: i32) -> (i32, i32) {
    %c0_i32 = arith.constant 0 : i32
    %c0_i32_0 = arith.constant 0 : i32
    %c0_i32_1 = arith.constant 0 : i32
    return %c0_i32, %c0_i32_0 : i32, i32
  }
  func.func @transform_6(%arg0: i32) -> (i32, i32) {
    %c0_i32 = arith.constant 0 : i32
    %c0_i32_0 = arith.constant 0 : i32
    %c0_i32_1 = arith.constant 0 : i32
    return %c0_i32, %c0_i32_0 : i32, i32
  }
  func.func @transform_7(%arg0: i32) -> (i32, i32) {
    %c0_i32 = arith.constant 0 : i32
    %c0_i32_0 = arith.constant 0 : i32
    %c0_i32_1 = arith.constant 0 : i32
    return %c0_i32, %c0_i32_0 : i32, i32
  }
  func.func @transform_8(%arg0: i32) -> (i32, i32) {
    %c0_i32 = arith.constant 0 : i32
    %c0_i32_0 = arith.constant 0 : i32
    return %c0_i32, %arg0 : i32, i32
  }
}

</mosaic_0001>

<bundles_post_ra>
// kernel: tpu_custom_call.1
= control target key start
LH: loop header
LB: loop body
LE: loop exit
PB: predicated region body
PF: predicated region fallthrough
CT: control target
= control target key end

     0   :  { %vm39_vm0 = vcmask 1043456   ;;  %vm35_vm1 = vcmask 64512   ;;  %s733_s0 = inlined_call_operand.vmem [shape: bf16[4,8,8], index: 0, kind: input, shape index: {}]   ;;  %s734_s1 = inlined_call_operand.vmem [shape: bf16[8,128], index: 1, kind: input, shape index: {}]   ;;  %s735_s2 = inlined_call_operand.vmem [shape: f32[4,128], index: 2, kind: input, shape index: {}]   ;;  %s736_s3 = inlined_call_operand.vmem [shape: bf16[128,64], index: 3, kind: input, shape index: {}]   ;;  %s737_s4 = inlined_call_operand.vmem [shape: f32[1,64], index: 4, kind: input, shape index: {}]   ;;  %s738_s5 = inlined_call_operand.vmem [shape: bf16[64,32], index: 5, kind: input, shape index: {}]   ;;  %s739_s6 = inlined_call_operand.vmem [shape: f32[1,32], index: 6, kind: input, shape index: {}]   ;;  %s740_s7 = inlined_call_operand.vmem [shape: bf16[1,32], index: 7, kind: input, shape index: {}]   ;;  %s741_s8 = inlined_call_operand.hbm [shape: f32[1,8], index: 8, kind: output, shape index: {}]  }
   0x1   :  { %v32_v0 = vld [vmem:[%s734_s1] sm:$0xf]  ;;  %v616_v2 = vld [vmem:[%s736_s3 + $0x38] sm:$0xff]  ;;  %v506_v4 = vld [vmem:[%s733_s0 + $0x4] sm:$0xf] }
   0x2   :  { %v611_v1 = vsel %vm39_vm0, %v32_v0, 0  ;;  %v31_v3 = vld [vmem:[%s733_s0] sm:$0xf]  ;;  %128 = vmatpush.bf16.msra.mxu1 %v616_v2  ;;  %v630_v5 = vld [vmem:[%s736_s3 + $0x30] sm:$0xff] }
   0x3   :  { %50 = vmatpush.bf16.msra.mxu0 %v611_v1  ;;  %216 = vmatpush.bf16.msra.mxu3 %v611_v1 }
   0x6   :  { %456 = vmatmul.msk.bf16.vlgmr.msra.gmra.mxu0 %vm35_vm1, %v31_v3  ;;  %507 = vmatmul.msk.bf16.vlgmr.msra.gmra.mxu3 %vm35_vm1, %v506_v4 }
   0x7   :  { %226 = vmatpush.bf16.msrb.mxu0 %v616_v2 }
   0x8   :  { %13 = vsyncpa [#allocation3], 0  ;;  %129 = vmatpush.bf16.msra.mxu1 %v630_v5  ;;  %v639_v6 = vld [vmem:[%s736_s3 + $0x28] sm:$0xff]  ;;  %v646_v7 = vld [vmem:[%s736_s3 + $0x20] sm:$0xff]  ;;  %vm181_vm5 = vcmask 523264   ;;  %vm420_vm15 = vcmask 261120  }
   0x9   :  { %v653_v8 = vld [vmem:[%s736_s3 + $0x18] sm:$0xff]  ;;  %v518_v9 = vld [vmem:[%s736_s3 + $0x10] sm:$0xff]  ;;  %v517_v10 = vld [vmem:[%s736_s3 + $0x8] sm:$0xff]  ;;  %s562_s23 = smov [#allocation2]   ;;  %s447_s27 = sshll.u32 %s741_s8, 4  ;;  %vm438_vm0 = vcmask 57344   ;;  %s448_s27 = int_to_ptr.hbm [resolvable:$true] %s447_s27 }
   0xa   :  { %v516_v11 = vld [vmem:[%s736_s3] sm:$0xff]  ;;  %v527_v12 = vld [vmem:[%s738_s5 + $0x18] sm:$0xff]  ;;  %v526_v13 = vld [vmem:[%s738_s5 + $0x10] sm:$0xff]  ;;  %s445_s24 = sshll.u32 %s562_s23, 4  ;;  %s446_s24 = int_to_ptr.vmem [resolvable:$true] %s445_s24 }
   0xb   :  { %227 = vmatpush.bf16.msrb.mxu0 %v630_v5  ;;  %189 = vmatpush.bf16.msra.mxu2 %v527_v12  ;;  %v530_v14 = vld [vmem:[%s735_s2] ss:$0 sm:$0xff]  ;;  %v531_v18 = vld [vmem:[%s735_s2 + $0x1] ss:$0 sm:$0xff]  ;;  %v525_v28 = vld [vmem:[%s738_s5 + $0x8] sm:$0xff] }
   0xc   :  { %130 = vmatpush.bf16.msra.mxu1 %v639_v6  ;;  %250 = vmatpush.bf16.msrb.mxu3 %v527_v12  ;;  %v524_v29 = vld [vmem:[%s738_s5] sm:$0xff]  ;;  %v509_v43 = vld [vmem:[%s733_s0 + $0x8] sm:$0xf]  ;;  %v512_v44 = vld [vmem:[%s733_s0 + $0xc] sm:$0xf] }
   0xd   :  { %v699_v30 = vld [vmem:[%s737_s4] ss:$0 sm:$0xff]  ;;  %v534_v56 = vld [vmem:[%s735_s2 + $0x2] ss:$0 sm:$0xff]  ;;  %v535_v0 = vld [vmem:[%s735_s2 + $0x3] ss:$0 sm:$0xff] }
   0xe   :  { %v533_v45 = vld [vmem:[%s739_s6] ss:$0 sm:$0xff] }
   0xf   :  { %228 = vmatpush.bf16.msrb.mxu0 %v639_v6  ;;  %190 = vmatpush.bf16.msra.mxu2 %v526_v13 }
  0x10   :  { %131 = vmatpush.bf16.msra.mxu1 %v646_v7  ;;  %251 = vmatpush.bf16.msrb.mxu3 %v526_v13 }
  0x13   :  { %229 = vmatpush.bf16.msrb.mxu0 %v646_v7  ;;  %191 = vmatpush.bf16.msra.mxu2 %v525_v28 }
  0x14   :  { %132 = vmatpush.bf16.msra.mxu1 %v653_v8  ;;  %252 = vmatpush.bf16.msrb.mxu3 %v525_v28 }
  0x17   :  { %230 = vmatpush.bf16.msrb.mxu0 %v653_v8  ;;  %192 = vmatpush.bf16.msra.mxu2 %v524_v29 }
  0x18   :  { %133 = vmatpush.bf16.msra.mxu1 %v518_v9  ;;  %253 = vmatpush.bf16.msrb.mxu3 %v524_v29 }
  0x1b   :  { %231 = vmatpush.bf16.msrb.mxu0 %v518_v9  ;;  %277 = vmatpush.bf16.msrb.mxu2 %v611_v1 }
  0x1c   :  { %134 = vmatpush.bf16.msra.mxu1 %v517_v10  ;;  %287 = vmatpush.bf16.msra.mxu3 %v616_v2 }
  0x1f   :  { %232 = vmatpush.bf16.msrb.mxu0 %v517_v10 }
  0x20   :  { %135 = vmatpush.bf16.msra.mxu1 %v516_v11  ;;  %288 = vmatpush.bf16.msra.mxu3 %v630_v5 }
  0x23   :  { %233 = vmatpush.bf16.msrb.mxu0 %v516_v11 }
  0x24   :  { %311 = vmatpush.bf16.msrb.mxu1 %v527_v12  ;;  %289 = vmatpush.bf16.msra.mxu3 %v639_v6 }
  0x27   :  { %348 = vmatpush.bf16.msra.mxu0 %v616_v2 }
  0x28   :  { %312 = vmatpush.bf16.msrb.mxu1 %v526_v13  ;;  %290 = vmatpush.bf16.msra.mxu3 %v646_v7 }
  0x2b   :  { %349 = vmatpush.bf16.msra.mxu0 %v630_v5 }
  0x2c   :  { %313 = vmatpush.bf16.msrb.mxu1 %v525_v28  ;;  %291 = vmatpush.bf16.msra.mxu3 %v653_v8 }
  0x2f   :  { %350 = vmatpush.bf16.msra.mxu0 %v639_v6 }
  0x30   :  { %314 = vmatpush.bf16.msrb.mxu1 %v524_v29  ;;  %292 = vmatpush.bf16.msra.mxu3 %v518_v9 }
  0x33   :  { %351 = vmatpush.bf16.msra.mxu0 %v646_v7 }
  0x34   :  { %293 = vmatpush.bf16.msra.mxu3 %v517_v10 }
  0x37   :  { %352 = vmatpush.bf16.msra.mxu0 %v653_v8 }
  0x38   :  { %294 = vmatpush.bf16.msra.mxu3 %v516_v11 }
  0x3b   :  { %353 = vmatpush.bf16.msra.mxu0 %v518_v9 }
  0x3f   :  { %354 = vmatpush.bf16.msra.mxu0 %v517_v10 }
  0x43   :  { %355 = vmatpush.bf16.msra.mxu0 %v516_v11 }
  0x83   :  { %v52_v15 = vpop.f32.mrf.mxu0 }
  0x84   :  { %v53_v16 = vadd.f32 %v530_v14, %v52_v15 }
  0x86   :  { %v57_v17 = vmul.f32 0.2, %v53_v16  ;;  %vm56_vm2 = vcmp.gt.f32.partialorder %v53_v16, 0.0 }
  0x88   :  { %v58_v19 = vsel %vm56_vm2, %v53_v16, %v57_v17 }
  0x89   :  { %v218_v20 = vpop.f32.mrf.mxu3  ;;  %v59_v21 = vpack.c.bf16 %v58_v19, %v58_v19 }
  0x8a   :  { %v219_v22 = vadd.f32 %v531_v18, %v218_v20 }
  0x8b   :  { %v54_v23 = vpop.f32.mrf.mxu0  ;;  %136 = vmatmul.bf16.vlgmr.msra.gmra.mxu1 %v59_v21 }
  0x8c   :  { %vm222_vm3 = vcmp.gt.f32.partialorder %v219_v22, 0.0  ;;  %v223_v24 = vmul.f32 0.2, %v219_v22  ;;  %372 = vmatpush.bf16.msra.mxu1 %v527_v12 }
  0x8e   :  { %v224_v25 = vsel %vm222_vm3, %v219_v22, %v223_v24 }
  0x8f   :  { %v225_v26 = vpack.c.bf16 %v224_v25, %v224_v25 }
  0x90   :  { %373 = vmatpush.bf16.msra.mxu1 %v526_v13 }
  0x91   :  { %234 = vmatmul.bf16.vlgmr.msrb.gmra.mxu0 %v225_v26  ;;  %v220_v27 = vpop.f32.mrf.mxu3 }
  0x94   :  { %374 = vmatpush.bf16.msra.mxu1 %v525_v28 }
  0x98   :  { %375 = vmatpush.bf16.msra.mxu1 %v524_v29 }
 0x108   :  { %v137_v31 = vpop.f32.mrf.mxu1 }
 0x109   :  { %v138_v32 = vadd.f32 %v699_v30, %v137_v31 }
 0x10b   :  { %vm141_vm4 = vcmp.gt.f32.partialorder %v138_v32, 0.0  ;;  %v142_v33 = vmul.f32 0.2, %v138_v32 }
 0x10d   :  { %v143_v34 = vsel %vm141_vm4, %v138_v32, %v142_v33 }
 0x10e   :  { %v235_v35 = vpop.f32.mrf.mxu0  ;;  %v144_v36 = vpack.c.bf16 %v143_v34, %v143_v34 }
 0x10f   :  { %v236_v37 = vadd.f32 %v699_v30, %v235_v35 }
 0x110   :  { %v139_v38 = vpop.f32.mrf.mxu1  ;;  %505 = vmatmul.msk.bf16.vlgmr.msra.gmra.mxu2 %vm181_vm5, %v144_v36 }
 0x111   :  { %vm239_vm6 = vcmp.gt.f32.partialorder %v236_v37, 0.0  ;;  %v240_v39 = vmul.f32 0.2, %v236_v37  ;;  %338 = vmatpush.bf16.msra.mxu2 %v611_v1 }
 0x113   :  { %v241_v40 = vsel %vm239_vm6, %v236_v37, %v240_v39  ;;  %v419_v37 = vld [vmem:[%s740_s7] sm:$0x1] }
 0x114   :  { %v242_v41 = vpack.c.bf16 %v241_v40, %v241_v40 }
 0x116   :  { %508 = vmatmul.msk.bf16.vlgmr.msrb.gmra.mxu3 %vm181_vm5, %v242_v41  ;;  %v237_v42 = vpop.f32.mrf.mxu0 }
 0x120   :  { %510 = vmatmul.msk.bf16.vlgmr.msrb.gmra.mxu2 %vm35_vm1, %v509_v43 }
 0x130   :  { %513 = vmatmul.msk.bf16.vlgmr.msra.gmra.mxu2 %vm35_vm1, %v512_v44 }
 0x193   :  { %v194_v46 = vpop.f32.mrf.mxu2 }
 0x194   :  { %v195_v47 = vadd.f32 %v533_v45, %v194_v46 }
 0x196   :  { %v199_v49 = vmul.f32 0.2, %v195_v47  ;;  %vm198_vm7 = vcmp.gt.f32.partialorder %v195_v47, 0.0 }
 0x198   :  { %v200_v53 = vsel %vm198_vm7, %v195_v47, %v199_v49 }
 0x199   :  { %v255_v48 = vpop.f32.mrf.mxu3 }
 0x19a   :  { %v256_v50 = vadd.f32 %v533_v45, %v255_v48 }
 0x19b   :  { %v196_v51 = vpop.f32.mrf.mxu2 }
 0x19c   :  { %vm259_vm8 = vcmp.gt.f32.partialorder %v256_v50, 0.0  ;;  %v260_v52 = vmul.f32 0.2, %v256_v50 }
 0x19e   :  { %v261_v54 = vsel %vm259_vm8, %v256_v50, %v260_v52 }
 0x19f   :  { %v262_v55 = vadd.f32 %v261_v54, %v200_v53 }
 0x1a1   :  { %v257_v57 = vpop.f32.mrf.mxu3 }
 0x1a3   :  { %v279_v58 = vpop.f32.mrf.mxu2 }
 0x1a4   :  { %v280_v59 = vadd.f32 %v534_v56, %v279_v58 }
 0x1a6   :  { %vm283_vm9 = vcmp.gt.f32.partialorder %v280_v59, 0.0  ;;  %v284_v60 = vmul.f32 0.2, %v280_v59 }
 0x1a8   :  { %v285_v61 = vsel %vm283_vm9, %v280_v59, %v284_v60 }
 0x1a9   :  { %v286_v62 = vpack.c.bf16 %v285_v61, %v285_v61 }
 0x1ab   :  { %v281_v63 = vpop.f32.mrf.mxu2  ;;  %295 = vmatmul.bf16.vlgmr.msra.gmra.mxu3 %v286_v62 }
 0x1b3   :  { %v340_v1 = vpop.f32.mrf.mxu2 }
 0x1b4   :  { %v341_v2 = vadd.f32 %v535_v0, %v340_v1 }
 0x1b6   :  { %vm344_vm10 = vcmp.gt.f32.partialorder %v341_v2, 0.0  ;;  %v345_v3 = vmul.f32 0.2, %v341_v2 }
 0x1b8   :  { %v346_v4 = vsel %vm344_vm10, %v341_v2, %v345_v3 }
 0x1b9   :  { %v347_v5 = vpack.c.bf16 %v346_v4, %v346_v4 }
 0x1bb   :  { %v342_v6 = vpop.f32.mrf.mxu2  ;;  %356 = vmatmul.bf16.vlgmr.msra.gmra.mxu0 %v347_v5 }
 0x22e   :  { %v296_v7 = vpop.f32.mrf.mxu3 }
 0x22f   :  { %v297_v8 = vadd.f32 %v699_v30, %v296_v7 }
 0x231   :  { %vm300_vm11 = vcmp.gt.f32.partialorder %v297_v8, 0.0  ;;  %v301_v9 = vmul.f32 0.2, %v297_v8 }
 0x233   :  { %v302_v10 = vsel %vm300_vm11, %v297_v8, %v301_v9 }
 0x234   :  { %v303_v11 = vpack.c.bf16 %v302_v10, %v302_v10 }
 0x236   :  { %v298_v12 = vpop.f32.mrf.mxu3  ;;  %511 = vmatmul.msk.bf16.vlgmr.msrb.gmra.mxu1 %vm181_vm5, %v303_v11 }
 0x238   :  { %v357_v13 = vpop.f32.mrf.mxu0 }
 0x239   :  { %v358_v14 = vadd.f32 %v699_v30, %v357_v13 }
 0x23b   :  { %v362_v15 = vmul.f32 0.2, %v358_v14  ;;  %vm361_vm12 = vcmp.gt.f32.partialorder %v358_v14, 0.0 }
 0x23d   :  { %v363_v17 = vsel %vm361_vm12, %v358_v14, %v362_v15 }
 0x23e   :  { %v364_v18 = vpack.c.bf16 %v363_v17, %v363_v17 }
 0x240   :  { %v359_v16 = vpop.f32.mrf.mxu0 }
 0x246   :  { %514 = vmatmul.msk.bf16.vlgmr.msra.gmra.mxu1 %vm181_vm5, %v364_v18 }
 0x2b3   :  { %v316_v19 = vpop.f32.mrf.mxu1 }
 0x2b4   :  { %v317_v21 = vadd.f32 %v533_v45, %v316_v19 }
 0x2b6   :  { %v321_v22 = vmul.f32 0.2, %v317_v21  ;;  %vm320_vm13 = vcmp.gt.f32.partialorder %v317_v21, 0.0 }
 0x2b8   :  { %v322_v25 = vsel %vm320_vm13, %v317_v21, %v321_v22 }
 0x2b9   :  { %v323_v27 = vadd.f32 %v322_v25, %v262_v55 }
 0x2bb   :  { %v318_v20 = vpop.f32.mrf.mxu1 }
 0x2c3   :  { %v377_v23 = vpop.f32.mrf.mxu1 }
 0x2c4   :  { %v378_v24 = vadd.f32 %v533_v45, %v377_v23 }
 0x2c6   :  { %v382_v26 = vmul.f32 0.2, %v378_v24  ;;  %vm381_vm14 = vcmp.gt.f32.partialorder %v378_v24, 0.0 }
 0x2c8   :  { %v383_v28 = vsel %vm381_vm14, %v378_v24, %v382_v26 }
 0x2c9   :  { %v384_v29 = vadd.f32 %v383_v28, %v323_v27 }
 0x2cb   :  { %v379_v30 = vpop.f32.mrf.mxu1  ;;  %385 = vxpose.xlu0.b32.start.end [1/1] (short) (narrow) %v384_v29, 32 }
 0x36f   :  { %v401_v31 = vpop.trf.xlu0 }
 0x377   :  { %v402_v32 = vpop.trf.xlu0 }
 0x378   :  { %v417_v36 = vpack.c.bf16 %v402_v32, %v401_v31 }
 0x37f   :  { %v403_v33 = vpop.trf.xlu0 }
 0x387   :  { %v404_v34 = vpop.trf.xlu0 }
 0x388   :  { %v418_v35 = vpack.c.bf16 %v404_v34, %v403_v33 }
 0x38a   :  { %430 = vmatpush.bf16.msrb.mxu2 %v418_v35 }
 0x38e   :  { %431 = vmatpush.bf16.msrb.mxu2 %v417_v36 }
 0x391   :  { %515 = vmatmul.msk.bf16.vlgmr.msrb.gmra.mxu2 %vm420_vm15, %v419_v37 }
 0x414   :  { %v433_v38 = vpop.f32.mrf.mxu2 }
 0x415   :  { %v437_v39 = vmul.f32 0.25, %v433_v38 }
 0x417   :  { %439 = vst.msk [vmem:[#allocation2] sm:$0x1] %vm438_vm0, %v437_v39 }
 0x418   :  { %450 = dma.vmem_to_hbm [thread:$0]  %s446_s24, 16, %s448_s27, [#allocation3]  }
 0x41c   :  { %v435_v40 = vpop.f32.mrf.mxu2 }
 0x41d   :  { %560 = dma.done.wait [#allocation3], 16  }
 0x41e   :  { %561 = vsyncadd [#allocation3], 4294967280 }
 0x41f   :  { %455 = vsyncpa [#allocation3], 1 }

</bundles_post_ra>
